<compile_context>
chip_gen: v7x
topology: tpu7x:2x2x1
jax: 0.10.0
libtpu: 0.0.40
codegen_flags: <defaults>
</compile_context>

<pallas_src>
import functools

import jax
import jax.numpy as jnp
import numpy as np
from jax.experimental import pallas as pl
from jax.experimental.pallas import tpu as pltpu


def _round_up(n, m):
    return (n + m - 1) // m * m


def _rnn_kernel(lengths_ref, g_ref, wh_ref, out_ref, last_ref,
                h_scratch, last_scratch):
    """One grid step == `block_t` RNN timesteps for one batch block.

    Hidden state and "last hidden" live in VMEM scratch and carry across the
    (inner, 'arbitrary') time-block grid axis.
    """
    tb = pl.program_id(1)                     # time-block index (inner axis)
    block_t = g_ref.shape[0]

    @pl.when(tb == 0)                         # new batch block -> reset state
    def _():
        h_scratch[...] = jnp.zeros_like(h_scratch)
        last_scratch[...] = jnp.zeros_like(last_scratch)

    lengths = lengths_ref[...]                # (Bb, 1) int32
    wh = wh_ref[...]                          # (Hp, Hp) matmul dtype (f32/bf16)
    h = h_scratch[...]                        # (Bb, Hp) f32 carry
    last = last_scratch[...]                  # (Bb, Hp) f32

    t0 = tb * block_t
    # Statically unrolled inner time loop: all slicing is static, one MXU push
    # per timestep, dense (8,128)-tile loads/stores, no per-step grid overhead.
    for i in range(block_t):
        t = t0 + i
        g_t = g_ref[i]                        # (Bb, Hp) f32: x_t@W_i + c@W_c + b
        pre = jnp.dot(h.astype(wh.dtype), wh,
                      preferred_element_type=jnp.float32) + g_t
        h = jnp.tanh(pre)                     # unconditional carry (short chain)
        active = t < lengths                  # (Bb, 1) bool
        # Padded-output semantics of pad_packed_sequence: zeros past length.
        out_ref[i] = jnp.where(active, h, 0.0).astype(out_ref.dtype)
        # Capture h at t = length-1 exactly once per sequence.
        last = jnp.where(t + 1 == lengths, h, last)

    h_scratch[...] = h
    last_scratch[...] = last
    # Constant block index along time -> resident output; writing every step is
    # one dense store per grid step and robust to writeback timing.
    last_ref[...] = last.astype(last_ref.dtype)


@functools.partial(
    jax.jit,
    static_argnames=("block_t", "b_block", "b_pad", "h_pad", "t_pad", "matmul_dtype"))
def _constrained_rnn_pallas(x_trim, constraints, lengths_b1, w_i, w_c, w_h, bias, *,
                            block_t, b_block, b_pad, h_pad, t_pad, matmul_dtype):
    B, Tm, _ = x_trim.shape
    H = w_h.shape[0]

    # --- Hoisted, time-parallel projection, emitted time-major directly (no
    # extra HBM transpose) with the constraint/bias projection folded in.
    g = jnp.einsum("bti,ih->tbh", x_trim, w_i)                  # (Tm, B, H)
    g = g + (constraints @ w_c + bias)[None, :, :]
    # Zero G past each sequence's length so the unconditional h carry can never
    # ingest non-finite user padding (tanh then keeps h bounded forever).
    t_idx = jnp.arange(Tm, dtype=jnp.int32)
    valid = (t_idx[:, None] < lengths_b1[:, 0][None, :])[..., None]  # (Tm, B, 1)
    g = jnp.where(valid, g, 0.0)

    # --- Pad to TPU-native tiles: B -> x8 sublanes, H -> x128 lanes,
    # T -> multiple of block_t.  Zero padding keeps padded hidden lanes at 0
    # (tanh(0)=0) and padded batch rows inactive (length 0).
    g = jnp.pad(g, ((0, t_pad - Tm), (0, b_pad - B), (0, h_pad - H)))
    wh = jnp.pad(w_h, ((0, h_pad - H), (0, h_pad - H))).astype(matmul_dtype)
    lens = jnp.pad(lengths_b1, ((0, b_pad - B), (0, 0)))

    n_b = b_pad // b_block
    n_t = t_pad // block_t

    # Explicit VMEM budget: double-buffered G + out blocks dominate; v5e's
    # 16 MiB / v7x's 32 MiB scoped defaults are easy to exceed at prod shapes.
    g_blk = block_t * b_block * h_pad * 4
    out_blk = block_t * b_block * h_pad * 4
    wh_bytes = h_pad * h_pad * jnp.dtype(matmul_dtype).itemsize
    small = b_block * 128 * 4 + b_block * h_pad * 4            # lengths + last
    scratch = 2 * b_block * h_pad * 4
    vmem_limit = min(int(1.5 * (2 * (g_blk + out_blk + wh_bytes + small) + scratch))
                     + (8 << 20), 128 << 20)

    out_p, last_p = pl.pallas_call(
        _rnn_kernel,
        out_shape=(
            jax.ShapeDtypeStruct((t_pad, b_pad, h_pad), jnp.float32),  # time-major
            jax.ShapeDtypeStruct((b_pad, h_pad), jnp.float32),         # last hidden
        ),
        grid_spec=pltpu.PrefetchScalarGridSpec(
            num_scalar_prefetch=0,
            grid=(n_b, n_t),                                   # batch outer, time inner
            in_specs=[
                pl.BlockSpec((b_block, 1), lambda bb, tb: (bb, 0)),            # lengths
                pl.BlockSpec((block_t, b_block, h_pad), lambda bb, tb: (tb, bb, 0)),  # G
                pl.BlockSpec((h_pad, h_pad), lambda bb, tb: (0, 0)),           # W_h
            ],
            out_specs=[
                pl.BlockSpec((block_t, b_block, h_pad), lambda bb, tb: (tb, bb, 0)),
                pl.BlockSpec((b_block, h_pad), lambda bb, tb: (bb, 0)),
            ],
            scratch_shapes=[
                pltpu.VMEM((b_block, h_pad), jnp.float32),     # h carry
                pltpu.VMEM((b_block, h_pad), jnp.float32),     # last hidden
            ],
        ),
        compiler_params=pltpu.CompilerParams(
            dimension_semantics=("parallel", "arbitrary"),     # batch || , time serial
            vmem_limit_bytes=vmem_limit,
        ),
    )(lens, g, wh)

    # One transpose back to batch-first, off the serial recurrence path.
    out = jnp.transpose(out_p[:Tm, :B, :H], (1, 0, 2))
    return out, last_p[:B, :H]


def constrained_rnn_forward(x_bti, constraints, lengths, params, *,
                            block_t=32, batch_blocks=1, matmul_dtype=jnp.bfloat16):
    """Mirrors ConstrainedRNN.forward (batch_first=True, h_t=None).

    Returns (padded_output [B, max(lengths), H], last_hidden [B, H]).
    batch_blocks=2 lets v7x shard independent batch blocks over its 2 TCs.
    """
    w_i, w_c, w_h, bias = params
    B = x_bti.shape[0]
    H = w_h.shape[0]

    # TODO(synk): for serving, bucket max_len and keep lengths on device to
    # bound recompiles / avoid the host sync (lengths is a host list here, as
    # in the PyTorch API).
    lengths_list = [int(l) for l in lengths]
    max_len = max(lengths_list)                 # pad_packed_sequence trims to max length
    x_trim = x_bti[:, :max_len, :]
    lengths_b1 = jnp.asarray(lengths_list, jnp.int32).reshape(-1, 1)

    b_pad0 = _round_up(B, 8)
    b_block = _round_up(pl.cdiv(b_pad0, batch_blocks), 8)
    b_pad = b_block * batch_blocks
    h_pad = _round_up(H, 128)
    t_pad = _round_up(max_len, block_t)

    return _constrained_rnn_pallas(
        x_trim, constraints, lengths_b1, w_i, w_c, w_h, bias,
        block_t=block_t, b_block=b_block, b_pad=b_pad, h_pad=h_pad, t_pad=t_pad,
        matmul_dtype=matmul_dtype)


def _reference(x_bti, constraints, lengths, params):
    """Plain-JAX reference implementing the same masked recurrence."""
    w_i, w_c, w_h, bias = params
    B, T, _ = x_bti.shape
    H = w_h.shape[0]
    h = jnp.zeros((B, H), jnp.float32)
    outs = []
    lengths_arr = jnp.asarray(lengths, jnp.int32)[:, None]
    for t in range(T):
        h_new = jnp.tanh(x_bti[:, t, :] @ w_i + constraints @ w_c + h @ w_h + bias)
        active = t < lengths_arr
        h = jnp.where(active, h_new, h)
        outs.append(jnp.where(active, h_new, 0.0))
    out = jnp.stack(outs, axis=1)
    max_len = int(max(lengths))
    return out[:, :max_len, :], h


if __name__ == "__main__":
    # Small shapes consistent with the module's forward; T spans two time blocks
    # so the cross-grid-step hidden-state carry is exercised.
    B, T = 4, 12
    input_size, n_constraints, hidden_size = 8, 4, 32

    key = jax.random.PRNGKey(0)
    kx, kc, k1, k2, k3, k4 = jax.random.split(key, 6)

    x = jax.random.normal(kx, (B, T, input_size), jnp.float32)          # batch-first
    constraints = jax.random.normal(kc, (B, n_constraints), jnp.float32)
    lengths = [12, 5, 3, 9]                                             # per-sequence lengths

    # Deterministic parameter init, matching nn.RNNCell's U(-1/sqrt(H), 1/sqrt(H)).
    bound = 1.0 / np.sqrt(hidden_size)
    w_i = jax.random.uniform(k1, (input_size, hidden_size), jnp.float32, -bound, bound)
    w_c = jax.random.uniform(k2, (n_constraints, hidden_size), jnp.float32, -bound, bound)
    w_h = jax.random.uniform(k3, (hidden_size, hidden_size), jnp.float32, -bound, bound)
    b = jax.random.uniform(k4, (1, hidden_size), jnp.float32, -bound, bound)  # b_ih+b_hh folded
    params = (w_i, w_c, w_h, b)

    ref_out, ref_last = _reference(x, constraints, lengths, params)

    # f32 MXU path: tight tolerance.
    out32, last32 = constrained_rnn_forward(
        x, constraints, lengths, params, block_t=8, matmul_dtype=jnp.float32)
    jax.block_until_ready((out32, last32))
    np.testing.assert_allclose(np.asarray(out32), np.asarray(ref_out), rtol=3e-3, atol=3e-3)
    np.testing.assert_allclose(np.asarray(last32), np.asarray(ref_last), rtol=3e-3, atol=3e-3)

    # bf16 MXU path (production default): rounding compounds through the
    # recurrence, so tolerance is relaxed.
    out16, last16 = constrained_rnn_forward(
        x, constraints, lengths, params, block_t=8, matmul_dtype=jnp.bfloat16)
    jax.block_until_ready((out16, last16))
    np.testing.assert_allclose(np.asarray(out16), np.asarray(ref_out), rtol=5e-2, atol=5e-2)
    np.testing.assert_allclose(np.asarray(last16), np.asarray(ref_last), rtol=5e-2, atol=5e-2)

    print("KERNEL_OK")
</pallas_src>

<mosaic_0001>
module attributes {stable_mosaic.version = 11 : i64} {
  func.func @_rnn_kernel(%arg0: i32, %arg1: i32, %arg2: memref<8x1xi32, #tpu.memory_space<vmem>>, %arg3: memref<8x8x128xf32, #tpu.memory_space<vmem>>, %arg4: memref<128x128xf32, #tpu.memory_space<vmem>>, %arg5: memref<8x8x128xf32, #tpu.memory_space<vmem>>, %arg6: memref<8x128xf32, #tpu.memory_space<vmem>>, %arg7: memref<8x128xf32, #tpu.memory_space<vmem>>, %arg8: memref<8x128xf32, #tpu.memory_space<vmem>>) attributes {dimension_semantics = [#tpu.dimension_semantics<parallel>, #tpu.dimension_semantics<arbitrary>], iteration_bounds = array<i64: 1, 2>, scalar_prefetch = 0 : i64, scratch_operands = 2 : i64, tpu.core_type = #tpu.core_type<tc>, window_params = [{transform_indices = @transform_0, window_bounds = array<i64: 8, 1>}, {transform_indices = @transform_1, window_bounds = array<i64: 8, 8, 128>}, {pipeline_mode = #tpu.pipeline_mode<synchronous>, transform_indices = @transform_2, window_bounds = array<i64: 128, 128>}, {transform_indices = @transform_3, window_bounds = array<i64: 8, 8, 128>}, {transform_indices = @transform_4, window_bounds = array<i64: 8, 128>}]} {
    %c0_i32 = arith.constant 0 : i32
    %0 = arith.cmpi eq, %arg1, %c0_i32 : i32
    %1 = arith.extui %0 : i1 to i32
    %c0_i32_0 = arith.constant 0 : i32
    %2 = arith.cmpi ne, %1, %c0_i32_0 : i32
    scf.if %2 {
      %cst_79 = arith.constant 0.000000e+00 : f32
      %179 = vector.broadcast %cst_79 : f32 to vector<8x128xf32>
      %c0_80 = arith.constant 0 : index
      %c0_81 = arith.constant 0 : index
      %180 = vector.load %arg7[%c0_80, %c0_81] : memref<8x128xf32, #tpu.memory_space<vmem>>, vector<8x128xf32>
      tpu.vector_store %arg7[%c0_80, %c0_81], %179 {strides = array<i32>} : memref<8x128xf32, #tpu.memory_space<vmem>>, vector<8x128xf32>,
      %cst_82 = arith.constant 0.000000e+00 : f32
      %181 = vector.broadcast %cst_82 : f32 to vector<8x128xf32>
      %c0_83 = arith.constant 0 : index
      %c0_84 = arith.constant 0 : index
      %182 = vector.load %arg8[%c0_83, %c0_84] : memref<8x128xf32, #tpu.memory_space<vmem>>, vector<8x128xf32>
      tpu.vector_store %arg8[%c0_83, %c0_84], %181 {strides = array<i32>} : memref<8x128xf32, #tpu.memory_space<vmem>>, vector<8x128xf32>,
    } else {
    }
    %c0 = arith.constant 0 : index
    %c0_1 = arith.constant 0 : index
    %3 = vector.load %arg2[%c0, %c0_1] : memref<8x1xi32, #tpu.memory_space<vmem>>, vector<8x1xi32>
    %c0_2 = arith.constant 0 : index
    %c0_3 = arith.constant 0 : index
    %4 = vector.load %arg4[%c0_2, %c0_3] : memref<128x128xf32, #tpu.memory_space<vmem>>, vector<128x128xf32>
    %c0_4 = arith.constant 0 : index
    %c0_5 = arith.constant 0 : index
    %5 = vector.load %arg7[%c0_4, %c0_5] : memref<8x128xf32, #tpu.memory_space<vmem>>, vector<8x128xf32>
    %c0_6 = arith.constant 0 : index
    %c0_7 = arith.constant 0 : index
    %6 = vector.load %arg8[%c0_6, %c0_7] : memref<8x128xf32, #tpu.memory_space<vmem>>, vector<8x128xf32>
    %c8_i32 = arith.constant 8 : i32
    %7 = arith.muli %arg1, %c8_i32 : i32
    %c0_i32_8 = arith.constant 0 : i32
    %8 = arith.addi %7, %c0_i32_8 : i32
    %c0_9 = arith.constant 0 : index
    %c0_10 = arith.constant 0 : index
    %c0_11 = arith.constant 0 : index
    %9 = vector.load %arg3[%c0_9, %c0_10, %c0_11] : memref<8x8x128xf32, #tpu.memory_space<vmem>>, vector<1x8x128xf32>
    %10 = vector.shape_cast %9 : vector<1x8x128xf32> to vector<8x128xf32>
    %cst = arith.constant dense<0.000000e+00> : vector<8x128xf32>
    %11 = tpu.matmul %5, %4, %cst {dimension_numbers = #tpu.dot_dimension_numbers<[1], [0], [0], [1], [0, 0, 1, 1], [], []>} : vector<8x128xf32>, vector<128x128xf32>, vector<8x128xf32> -> vector<8x128xf32>
    %12 = arith.addf %11, %10 : vector<8x128xf32>
    %13 = math.tanh %12 : vector<8x128xf32>
    %14 = vector.broadcast %8 : i32 to vector<8x1xi32>
    %15 = arith.cmpi slt, %14, %3 : vector<8x1xi32>
    %cst_12 = arith.constant 0.000000e+00 : f32
    %16 = vector.shape_cast %15 : vector<8x1xi1> to vector<8x1xi1>
    %17 = vector.broadcast %16 : vector<8x1xi1> to vector<8x128xi1>
    %18 = vector.broadcast %cst_12 : f32 to vector<8x128xf32>
    %19 = arith.select %17, %13, %18 : vector<8x128xi1>, vector<8x128xf32>
    %c0_13 = arith.constant 0 : index
    %c0_14 = arith.constant 0 : index
    %c0_15 = arith.constant 0 : index
    %20 = vector.load %arg5[%c0_13, %c0_14, %c0_15] : memref<8x8x128xf32, #tpu.memory_space<vmem>>, vector<1x8x128xf32>
    %21 = vector.shape_cast %20 : vector<1x8x128xf32> to vector<8x128xf32>
    %22 = vector.shape_cast %19 : vector<8x128xf32> to vector<1x8x128xf32>
    tpu.vector_store %arg5[%c0_13, %c0_14, %c0_15], %22 {strides = array<i32>} : memref<8x8x128xf32, #tpu.memory_space<vmem>>, vector<1x8x128xf32>,
    %c1_i32 = arith.constant 1 : i32
    %23 = arith.addi %8, %c1_i32 : i32
    %24 = vector.broadcast %23 : i32 to vector<8x1xi32>
    %25 = arith.cmpi eq, %24, %3 : vector<8x1xi32>
    %26 = vector.shape_cast %25 : vector<8x1xi1> to vector<8x1xi1>
    %27 = vector.broadcast %26 : vector<8x1xi1> to vector<8x128xi1>
    %28 = arith.select %27, %13, %6 : vector<8x128xi1>, vector<8x128xf32>
    %c1_i32_16 = arith.constant 1 : i32
    %29 = arith.addi %7, %c1_i32_16 : i32
    %c1 = arith.constant 1 : index
    %c0_17 = arith.constant 0 : index
    %c0_18 = arith.constant 0 : index
    %30 = vector.load %arg3[%c1, %c0_17, %c0_18] : memref<8x8x128xf32, #tpu.memory_space<vmem>>, vector<1x8x128xf32>
    %31 = vector.shape_cast %30 : vector<1x8x128xf32> to vector<8x128xf32>
    %cst_19 = arith.constant dense<0.000000e+00> : vector<8x128xf32>
    %32 = tpu.matmul %13, %4, %cst_19 {dimension_numbers = #tpu.dot_dimension_numbers<[1], [0], [0], [1], [0, 0, 1, 1], [], []>} : vector<8x128xf32>, vector<128x128xf32>, vector<8x128xf32> -> vector<8x128xf32>
    %33 = arith.addf %32, %31 : vector<8x128xf32>
    %34 = math.tanh %33 : vector<8x128xf32>
    %35 = vector.broadcast %29 : i32 to vector<8x1xi32>
    %36 = arith.cmpi slt, %35, %3 : vector<8x1xi32>
    %cst_20 = arith.constant 0.000000e+00 : f32
    %37 = vector.shape_cast %36 : vector<8x1xi1> to vector<8x1xi1>
    %38 = vector.broadcast %37 : vector<8x1xi1> to vector<8x128xi1>
    %39 = vector.broadcast %cst_20 : f32 to vector<8x128xf32>
    %40 = arith.select %38, %34, %39 : vector<8x128xi1>, vector<8x128xf32>
    %c1_21 = arith.constant 1 : index
    %c0_22 = arith.constant 0 : index
    %c0_23 = arith.constant 0 : index
    %41 = vector.load %arg5[%c1_21, %c0_22, %c0_23] : memref<8x8x128xf32, #tpu.memory_space<vmem>>, vector<1x8x128xf32>
    %42 = vector.shape_cast %41 : vector<1x8x128xf32> to vector<8x128xf32>
    %43 = vector.shape_cast %40 : vector<8x128xf32> to vector<1x8x128xf32>
    tpu.vector_store %arg5[%c1_21, %c0_22, %c0_23], %43 {strides = array<i32>} : memref<8x8x128xf32, #tpu.memory_space<vmem>>, vector<1x8x128xf32>,
    %c1_i32_24 = arith.constant 1 : i32
    %44 = arith.addi %29, %c1_i32_24 : i32
    %45 = vector.broadcast %44 : i32 to vector<8x1xi32>
    %46 = arith.cmpi eq, %45, %3 : vector<8x1xi32>
    %47 = vector.shape_cast %46 : vector<8x1xi1> to vector<8x1xi1>
    %48 = vector.broadcast %47 : vector<8x1xi1> to vector<8x128xi1>
    %49 = arith.select %48, %34, %28 : vector<8x128xi1>, vector<8x128xf32>
    %c2_i32 = arith.constant 2 : i32
    %50 = arith.addi %7, %c2_i32 : i32
    %c2 = arith.constant 2 : index
    %c0_25 = arith.constant 0 : index
    %c0_26 = arith.constant 0 : index
    %51 = vector.load %arg3[%c2, %c0_25, %c0_26] : memref<8x8x128xf32, #tpu.memory_space<vmem>>, vector<1x8x128xf32>
    %52 = vector.shape_cast %51 : vector<1x8x128xf32> to vector<8x128xf32>
    %cst_27 = arith.constant dense<0.000000e+00> : vector<8x128xf32>
    %53 = tpu.matmul %34, %4, %cst_27 {dimension_numbers = #tpu.dot_dimension_numbers<[1], [0], [0], [1], [0, 0, 1, 1], [], []>} : vector<8x128xf32>, vector<128x128xf32>, vector<8x128xf32> -> vector<8x128xf32>
    %54 = arith.addf %53, %52 : vector<8x128xf32>
    %55 = math.tanh %54 : vector<8x128xf32>
    %56 = vector.broadcast %50 : i32 to vector<8x1xi32>
    %57 = arith.cmpi slt, %56, %3 : vector<8x1xi32>
    %cst_28 = arith.constant 0.000000e+00 : f32
    %58 = vector.shape_cast %57 : vector<8x1xi1> to vector<8x1xi1>
    %59 = vector.broadcast %58 : vector<8x1xi1> to vector<8x128xi1>
    %60 = vector.broadcast %cst_28 : f32 to vector<8x128xf32>
    %61 = arith.select %59, %55, %60 : vector<8x128xi1>, vector<8x128xf32>
    %c2_29 = arith.constant 2 : index
    %c0_30 = arith.constant 0 : index
    %c0_31 = arith.constant 0 : index
    %62 = vector.load %arg5[%c2_29, %c0_30, %c0_31] : memref<8x8x128xf32, #tpu.memory_space<vmem>>, vector<1x8x128xf32>
    %63 = vector.shape_cast %62 : vector<1x8x128xf32> to vector<8x128xf32>
    %64 = vector.shape_cast %61 : vector<8x128xf32> to vector<1x8x128xf32>
    tpu.vector_store %arg5[%c2_29, %c0_30, %c0_31], %64 {strides = array<i32>} : memref<8x8x128xf32, #tpu.memory_space<vmem>>, vector<1x8x128xf32>,
    %c1_i32_32 = arith.constant 1 : i32
    %65 = arith.addi %50, %c1_i32_32 : i32
    %66 = vector.broadcast %65 : i32 to vector<8x1xi32>
    %67 = arith.cmpi eq, %66, %3 : vector<8x1xi32>
    %68 = vector.shape_cast %67 : vector<8x1xi1> to vector<8x1xi1>
    %69 = vector.broadcast %68 : vector<8x1xi1> to vector<8x128xi1>
    %70 = arith.select %69, %55, %49 : vector<8x128xi1>, vector<8x128xf32>
    %c3_i32 = arith.constant 3 : i32
    %71 = arith.addi %7, %c3_i32 : i32
    %c3 = arith.constant 3 : index
    %c0_33 = arith.constant 0 : index
    %c0_34 = arith.constant 0 : index
    %72 = vector.load %arg3[%c3, %c0_33, %c0_34] : memref<8x8x128xf32, #tpu.memory_space<vmem>>, vector<1x8x128xf32>
    %73 = vector.shape_cast %72 : vector<1x8x128xf32> to vector<8x128xf32>
    %cst_35 = arith.constant dense<0.000000e+00> : vector<8x128xf32>
    %74 = tpu.matmul %55, %4, %cst_35 {dimension_numbers = #tpu.dot_dimension_numbers<[1], [0], [0], [1], [0, 0, 1, 1], [], []>} : vector<8x128xf32>, vector<128x128xf32>, vector<8x128xf32> -> vector<8x128xf32>
    %75 = arith.addf %74, %73 : vector<8x128xf32>
    %76 = math.tanh %75 : vector<8x128xf32>
    %77 = vector.broadcast %71 : i32 to vector<8x1xi32>
    %78 = arith.cmpi slt, %77, %3 : vector<8x1xi32>
    %cst_36 = arith.constant 0.000000e+00 : f32
    %79 = vector.shape_cast %78 : vector<8x1xi1> to vector<8x1xi1>
    %80 = vector.broadcast %79 : vector<8x1xi1> to vector<8x128xi1>
    %81 = vector.broadcast %cst_36 : f32 to vector<8x128xf32>
    %82 = arith.select %80, %76, %81 : vector<8x128xi1>, vector<8x128xf32>
    %c3_37 = arith.constant 3 : index
    %c0_38 = arith.constant 0 : index
    %c0_39 = arith.constant 0 : index
    %83 = vector.load %arg5[%c3_37, %c0_38, %c0_39] : memref<8x8x128xf32, #tpu.memory_space<vmem>>, vector<1x8x128xf32>
    %84 = vector.shape_cast %83 : vector<1x8x128xf32> to vector<8x128xf32>
    %85 = vector.shape_cast %82 : vector<8x128xf32> to vector<1x8x128xf32>
    tpu.vector_store %arg5[%c3_37, %c0_38, %c0_39], %85 {strides = array<i32>} : memref<8x8x128xf32, #tpu.memory_space<vmem>>, vector<1x8x128xf32>,
    %c1_i32_40 = arith.constant 1 : i32
    %86 = arith.addi %71, %c1_i32_40 : i32
    %87 = vector.broadcast %86 : i32 to vector<8x1xi32>
    %88 = arith.cmpi eq, %87, %3 : vector<8x1xi32>
    %89 = vector.shape_cast %88 : vector<8x1xi1> to vector<8x1xi1>
    %90 = vector.broadcast %89 : vector<8x1xi1> to vector<8x128xi1>
    %91 = arith.select %90, %76, %70 : vector<8x128xi1>, vector<8x128xf32>
    %c4_i32 = arith.constant 4 : i32
    %92 = arith.addi %7, %c4_i32 : i32
    %c4 = arith.constant 4 : index
    %c0_41 = arith.constant 0 : index
    %c0_42 = arith.constant 0 : index
    %93 = vector.load %arg3[%c4, %c0_41, %c0_42] : memref<8x8x128xf32, #tpu.memory_space<vmem>>, vector<1x8x128xf32>
    %94 = vector.shape_cast %93 : vector<1x8x128xf32> to vector<8x128xf32>
    %cst_43 = arith.constant dense<0.000000e+00> : vector<8x128xf32>
    %95 = tpu.matmul %76, %4, %cst_43 {dimension_numbers = #tpu.dot_dimension_numbers<[1], [0], [0], [1], [0, 0, 1, 1], [], []>} : vector<8x128xf32>, vector<128x128xf32>, vector<8x128xf32> -> vector<8x128xf32>
    %96 = arith.addf %95, %94 : vector<8x128xf32>
    %97 = math.tanh %96 : vector<8x128xf32>
    %98 = vector.broadcast %92 : i32 to vector<8x1xi32>
    %99 = arith.cmpi slt, %98, %3 : vector<8x1xi32>
    %cst_44 = arith.constant 0.000000e+00 : f32
    %100 = vector.shape_cast %99 : vector<8x1xi1> to vector<8x1xi1>
    %101 = vector.broadcast %100 : vector<8x1xi1> to vector<8x128xi1>
    %102 = vector.broadcast %cst_44 : f32 to vector<8x128xf32>
    %103 = arith.select %101, %97, %102 : vector<8x128xi1>, vector<8x128xf32>
    %c4_45 = arith.constant 4 : index
    %c0_46 = arith.constant 0 : index
    %c0_47 = arith.constant 0 : index
    %104 = vector.load %arg5[%c4_45, %c0_46, %c0_47] : memref<8x8x128xf32, #tpu.memory_space<vmem>>, vector<1x8x128xf32>
    %105 = vector.shape_cast %104 : vector<1x8x128xf32> to vector<8x128xf32>
    %106 = vector.shape_cast %103 : vector<8x128xf32> to vector<1x8x128xf32>
    tpu.vector_store %arg5[%c4_45, %c0_46, %c0_47], %106 {strides = array<i32>} : memref<8x8x128xf32, #tpu.memory_space<vmem>>, vector<1x8x128xf32>,
    %c1_i32_48 = arith.constant 1 : i32
    %107 = arith.addi %92, %c1_i32_48 : i32
    %108 = vector.broadcast %107 : i32 to vector<8x1xi32>
    %109 = arith.cmpi eq, %108, %3 : vector<8x1xi32>
    %110 = vector.shape_cast %109 : vector<8x1xi1> to vector<8x1xi1>
    %111 = vector.broadcast %110 : vector<8x1xi1> to vector<8x128xi1>
    %112 = arith.select %111, %97, %91 : vector<8x128xi1>, vector<8x128xf32>
    %c5_i32 = arith.constant 5 : i32
    %113 = arith.addi %7, %c5_i32 : i32
    %c5 = arith.constant 5 : index
    %c0_49 = arith.constant 0 : index
    %c0_50 = arith.constant 0 : index
    %114 = vector.load %arg3[%c5, %c0_49, %c0_50] : memref<8x8x128xf32, #tpu.memory_space<vmem>>, vector<1x8x128xf32>
    %115 = vector.shape_cast %114 : vector<1x8x128xf32> to vector<8x128xf32>
    %cst_51 = arith.constant dense<0.000000e+00> : vector<8x128xf32>
    %116 = tpu.matmul %97, %4, %cst_51 {dimension_numbers = #tpu.dot_dimension_numbers<[1], [0], [0], [1], [0, 0, 1, 1], [], []>} : vector<8x128xf32>, vector<128x128xf32>, vector<8x128xf32> -> vector<8x128xf32>
    %117 = arith.addf %116, %115 : vector<8x128xf32>
    %118 = math.tanh %117 : vector<8x128xf32>
    %119 = vector.broadcast %113 : i32 to vector<8x1xi32>
    %120 = arith.cmpi slt, %119, %3 : vector<8x1xi32>
    %cst_52 = arith.constant 0.000000e+00 : f32
    %121 = vector.shape_cast %120 : vector<8x1xi1> to vector<8x1xi1>
    %122 = vector.broadcast %121 : vector<8x1xi1> to vector<8x128xi1>
    %123 = vector.broadcast %cst_52 : f32 to vector<8x128xf32>
    %124 = arith.select %122, %118, %123 : vector<8x128xi1>, vector<8x128xf32>
    %c5_53 = arith.constant 5 : index
    %c0_54 = arith.constant 0 : index
    %c0_55 = arith.constant 0 : index
    %125 = vector.load %arg5[%c5_53, %c0_54, %c0_55] : memref<8x8x128xf32, #tpu.memory_space<vmem>>, vector<1x8x128xf32>
    %126 = vector.shape_cast %125 : vector<1x8x128xf32> to vector<8x128xf32>
    %127 = vector.shape_cast %124 : vector<8x128xf32> to vector<1x8x128xf32>
    tpu.vector_store %arg5[%c5_53, %c0_54, %c0_55], %127 {strides = array<i32>} : memref<8x8x128xf32, #tpu.memory_space<vmem>>, vector<1x8x128xf32>,
    %c1_i32_56 = arith.constant 1 : i32
    %128 = arith.addi %113, %c1_i32_56 : i32
    %129 = vector.broadcast %128 : i32 to vector<8x1xi32>
    %130 = arith.cmpi eq, %129, %3 : vector<8x1xi32>
    %131 = vector.shape_cast %130 : vector<8x1xi1> to vector<8x1xi1>
    %132 = vector.broadcast %131 : vector<8x1xi1> to vector<8x128xi1>
    %133 = arith.select %132, %118, %112 : vector<8x128xi1>, vector<8x128xf32>
    %c6_i32 = arith.constant 6 : i32
    %134 = arith.addi %7, %c6_i32 : i32
    %c6 = arith.constant 6 : index
    %c0_57 = arith.constant 0 : index
    %c0_58 = arith.constant 0 : index
    %135 = vector.load %arg3[%c6, %c0_57, %c0_58] : memref<8x8x128xf32, #tpu.memory_space<vmem>>, vector<1x8x128xf32>
    %136 = vector.shape_cast %135 : vector<1x8x128xf32> to vector<8x128xf32>
    %cst_59 = arith.constant dense<0.000000e+00> : vector<8x128xf32>
    %137 = tpu.matmul %118, %4, %cst_59 {dimension_numbers = #tpu.dot_dimension_numbers<[1], [0], [0], [1], [0, 0, 1, 1], [], []>} : vector<8x128xf32>, vector<128x128xf32>, vector<8x128xf32> -> vector<8x128xf32>
    %138 = arith.addf %137, %136 : vector<8x128xf32>
    %139 = math.tanh %138 : vector<8x128xf32>
    %140 = vector.broadcast %134 : i32 to vector<8x1xi32>
    %141 = arith.cmpi slt, %140, %3 : vector<8x1xi32>
    %cst_60 = arith.constant 0.000000e+00 : f32
    %142 = vector.shape_cast %141 : vector<8x1xi1> to vector<8x1xi1>
    %143 = vector.broadcast %142 : vector<8x1xi1> to vector<8x128xi1>
    %144 = vector.broadcast %cst_60 : f32 to vector<8x128xf32>
    %145 = arith.select %143, %139, %144 : vector<8x128xi1>, vector<8x128xf32>
    %c6_61 = arith.constant 6 : index
    %c0_62 = arith.constant 0 : index
    %c0_63 = arith.constant 0 : index
    %146 = vector.load %arg5[%c6_61, %c0_62, %c0_63] : memref<8x8x128xf32, #tpu.memory_space<vmem>>, vector<1x8x128xf32>
    %147 = vector.shape_cast %146 : vector<1x8x128xf32> to vector<8x128xf32>
    %148 = vector.shape_cast %145 : vector<8x128xf32> to vector<1x8x128xf32>
    tpu.vector_store %arg5[%c6_61, %c0_62, %c0_63], %148 {strides = array<i32>} : memref<8x8x128xf32, #tpu.memory_space<vmem>>, vector<1x8x128xf32>,
    %c1_i32_64 = arith.constant 1 : i32
    %149 = arith.addi %134, %c1_i32_64 : i32
    %150 = vector.broadcast %149 : i32 to vector<8x1xi32>
    %151 = arith.cmpi eq, %150, %3 : vector<8x1xi32>
    %152 = vector.shape_cast %151 : vector<8x1xi1> to vector<8x1xi1>
    %153 = vector.broadcast %152 : vector<8x1xi1> to vector<8x128xi1>
    %154 = arith.select %153, %139, %133 : vector<8x128xi1>, vector<8x128xf32>
    %c7_i32 = arith.constant 7 : i32
    %155 = arith.addi %7, %c7_i32 : i32
    %c7 = arith.constant 7 : index
    %c0_65 = arith.constant 0 : index
    %c0_66 = arith.constant 0 : index
    %156 = vector.load %arg3[%c7, %c0_65, %c0_66] : memref<8x8x128xf32, #tpu.memory_space<vmem>>, vector<1x8x128xf32>
    %157 = vector.shape_cast %156 : vector<1x8x128xf32> to vector<8x128xf32>
    %cst_67 = arith.constant dense<0.000000e+00> : vector<8x128xf32>
    %158 = tpu.matmul %139, %4, %cst_67 {dimension_numbers = #tpu.dot_dimension_numbers<[1], [0], [0], [1], [0, 0, 1, 1], [], []>} : vector<8x128xf32>, vector<128x128xf32>, vector<8x128xf32> -> vector<8x128xf32>
    %159 = arith.addf %158, %157 : vector<8x128xf32>
    %160 = math.tanh %159 : vector<8x128xf32>
    %161 = vector.broadcast %155 : i32 to vector<8x1xi32>
    %162 = arith.cmpi slt, %161, %3 : vector<8x1xi32>
    %cst_68 = arith.constant 0.000000e+00 : f32
    %163 = vector.shape_cast %162 : vector<8x1xi1> to vector<8x1xi1>
    %164 = vector.broadcast %163 : vector<8x1xi1> to vector<8x128xi1>
    %165 = vector.broadcast %cst_68 : f32 to vector<8x128xf32>
    %166 = arith.select %164, %160, %165 : vector<8x128xi1>, vector<8x128xf32>
    %c7_69 = arith.constant 7 : index
    %c0_70 = arith.constant 0 : index
    %c0_71 = arith.constant 0 : index
    %167 = vector.load %arg5[%c7_69, %c0_70, %c0_71] : memref<8x8x128xf32, #tpu.memory_space<vmem>>, vector<1x8x128xf32>
    %168 = vector.shape_cast %167 : vector<1x8x128xf32> to vector<8x128xf32>
    %169 = vector.shape_cast %166 : vector<8x128xf32> to vector<1x8x128xf32>
    tpu.vector_store %arg5[%c7_69, %c0_70, %c0_71], %169 {strides = array<i32>} : memref<8x8x128xf32, #tpu.memory_space<vmem>>, vector<1x8x128xf32>,
    %c1_i32_72 = arith.constant 1 : i32
    %170 = arith.addi %155, %c1_i32_72 : i32
    %171 = vector.broadcast %170 : i32 to vector<8x1xi32>
    %172 = arith.cmpi eq, %171, %3 : vector<8x1xi32>
    %173 = vector.shape_cast %172 : vector<8x1xi1> to vector<8x1xi1>
    %174 = vector.broadcast %173 : vector<8x1xi1> to vector<8x128xi1>
    %175 = arith.select %174, %160, %154 : vector<8x128xi1>, vector<8x128xf32>
    %c0_73 = arith.constant 0 : index
    %c0_74 = arith.constant 0 : index
    %176 = vector.load %arg7[%c0_73, %c0_74] : memref<8x128xf32, #tpu.memory_space<vmem>>, vector<8x128xf32>
    tpu.vector_store %arg7[%c0_73, %c0_74], %160 {strides = array<i32>} : memref<8x128xf32, #tpu.memory_space<vmem>>, vector<8x128xf32>,
    %c0_75 = arith.constant 0 : index
    %c0_76 = arith.constant 0 : index
    %177 = vector.load %arg8[%c0_75, %c0_76] : memref<8x128xf32, #tpu.memory_space<vmem>>, vector<8x128xf32>
    tpu.vector_store %arg8[%c0_75, %c0_76], %175 {strides = array<i32>} : memref<8x128xf32, #tpu.memory_space<vmem>>, vector<8x128xf32>,
    %c0_77 = arith.constant 0 : index
    %c0_78 = arith.constant 0 : index
    %178 = vector.load %arg6[%c0_77, %c0_78] : memref<8x128xf32, #tpu.memory_space<vmem>>, vector<8x128xf32>
    tpu.vector_store %arg6[%c0_77, %c0_78], %175 {strides = array<i32>} : memref<8x128xf32, #tpu.memory_space<vmem>>, vector<8x128xf32>,
    return
  }
  func.func @transform_0(%arg0: i32, %arg1: i32) -> (i32, i32) {
    %c0_i32 = arith.constant 0 : i32
    %c0_i32_0 = arith.constant 0 : i32
    return %arg0, %c0_i32 : i32, i32
  }
  func.func @transform_1(%arg0: i32, %arg1: i32) -> (i32, i32, i32) {
    %c0_i32 = arith.constant 0 : i32
    %c0_i32_0 = arith.constant 0 : i32
    return %arg1, %arg0, %c0_i32 : i32, i32, i32
  }
  func.func @transform_2(%arg0: i32, %arg1: i32) -> (i32, i32) {
    %c0_i32 = arith.constant 0 : i32
    %c0_i32_0 = arith.constant 0 : i32
    %c0_i32_1 = arith.constant 0 : i32
    return %c0_i32, %c0_i32_0 : i32, i32
  }
  func.func @transform_3(%arg0: i32, %arg1: i32) -> (i32, i32, i32) {
    %c0_i32 = arith.constant 0 : i32
    %c0_i32_0 = arith.constant 0 : i32
    return %arg1, %arg0, %c0_i32 : i32, i32, i32
  }
  func.func @transform_4(%arg0: i32, %arg1: i32) -> (i32, i32) {
    %c0_i32 = arith.constant 0 : i32
    %c0_i32_0 = arith.constant 0 : i32
    return %arg0, %c0_i32 : i32, i32
  }
}

</mosaic_0001>

<bundles_post_ra>
// kernel: _constrained_rnn_pallas.1
= control target key start
LH: loop header
LB: loop body
LE: loop exit
PB: predicated region body
PF: predicated region fallthrough
CT: control target
= control target key end

     0   :  { %s1875_s15 = smov 0   ;;  %s1877_s16 = smov 0   ;;  %s2230_s0 = inlined_call_operand.vmem [shape: s32[8,1], index: 0, kind: input, shape index: {}]   ;;  %s2231_s1 = inlined_call_operand.vmem [shape: f32[16,8,128], index: 1, kind: input, shape index: {}]   ;;  %s2232_s2 = inlined_call_operand.vmem [shape: f32[128,128], index: 2, kind: input, shape index: {}]   ;;  %s2233_s3 = inlined_call_operand.vmem [shape: f32[16,8,128], index: 3, kind: output, shape index: {0}]   ;;  %s2234_s4 = inlined_call_operand.vmem [shape: f32[8,128], index: 4, kind: output, shape index: {1}]  }
   0x1   :  { %s1879_s17 = smov 0  }
   0x2 LB: > { %s24_s18 = sadd.s32 1, %s1839_s16  ;;  %p1142_p0 = scmp.ge.s32.totalorder %s1843_s17, 1  ;;  %s1843_s17 = sphi %s1879_s17, %s15_s17   ;;  %s1839_s16 = sphi %s1877_s16, %s2236_s16   ;;  %s1835_s15 = sphi %s1875_s15, %s2235_s15  }
   0x3   : > { %p25_p1 = scmp.ge.s32.totalorder %s24_s18, 2  ;;  %p194_p2 = scmp.lt.s32.totalorder %s1843_s17, 3 }
   0x5   : > { %s2238_s18 = smov (%p25_p1, %s24_s18), 0  ;;  %p195_p3 = pnand %p1142_p0, %p194_p2 }
   0x6   : > { %s1893_s19 = sshll.u32 (!%p195_p3), %s1835_s15, 3  ;;  %p1147_p5 = scmp.ne.s32.totalorder (!%p195_p3), %s1835_s15, 0 }
   0x7   : > { %198 = sbr.rel (%p195_p3) target bundleno = 1859 (0x743), region = 32  ;;  %p239_p4 = scmp.lt.s32.totalorder (!%p195_p3), %s1893_s19, 15 }
   0xe   : > { %s240_s20 = scalar_select %p239_p4, %s1893_s19, 15 }
   0xf   : > { %263 = sbr.rel (%p1147_p5) target bundleno = 22 (0x16), region = 36  ;;  %v1845_v0 = vmov (!%p1147_p5), 0.0  }
  0x10   : > { %s1144_s21 = sshll.u32 %s240_s20, 3  ;;  %264 = vst [vmem:[#allocation2] sm:$0xff] (!%p1147_p5), %v1845_v0  ;;  %265 = vst [vmem:[#allocation3] sm:$0xff] (!%p1147_p5), %v1845_v0 }
  0x11   : > { %s1900_s24 = scalar_lea.vmem %s2231_s1, %s1144_s21  ;;  %s1905_s27 = scalar_lea.vmem %s2233_s3, %s1144_s21 }
  0x16 PF: > { %v267_v1 = vld [vmem:[%s2232_s2] sm:$0xff]  ;;  %v268_v2 = vld [vmem:[%s2232_s2 + $0x8] sm:$0xff]  ;;  %v269_v3 = vld [vmem:[%s2232_s2 + $0x10] sm:$0xff]  ;;  %v1846_v4 = vmov 0.0|0.0   ;;  %vm1847_vm0 = vmmov 0   ;;  %v1848_v7 = vmov 0.0   ;;  %v358_v24 = vstv %s1893_s19 }
  0x17   : > { %1582 = vmatprep.subr.bf16.mxu0 %v1846_v4  ;;  %v1917_v5 = vpack.c.bf16 %v268_v2, %v267_v1  ;;  %v270_v6 = vld [vmem:[%s2232_s2 + $0x18] sm:$0xff]  ;;  %1334 = vmatprep.mubr.msk.f32.mxu0 %vm1847_vm0, %v1848_v7  ;;  %s549_s10 = sadd.s32 3, %s1893_s19  ;;  %s640_s11 = sadd.s32 4, %s1893_s19  ;;  %v1849_v8 = vmov 0   ;;  %v271_v12 = vld [vmem:[%s2232_s2 + $0x20] sm:$0xff]  ;;  %v272_v13 = vld [vmem:[%s2232_s2 + $0x28] sm:$0xff] }
  0x18   : > { %1804 = vset.pattern.permute.xlu1 %v1849_v8  ;;  %1803 = vset.pattern.permute.xlu0 %v1849_v8  ;;  %s367_s12 = sadd.s32 1, %s1893_s19  ;;  %v1930_v9 = vpack.c.bf16 %v270_v6, %v269_v3  ;;  %v1932_v10 = vstv %s549_s10  ;;  %v1934_v11 = vstv %s640_s11  ;;  %s822_s21 = sadd.s32 6, %s1893_s19  ;;  %v1949_v14 = vld [vmem:[%s2230_s0] sm:$0xff]  ;;  %v1961_v16 = vpack.c.bf16 %v272_v13, %v271_v12  ;;  %v273_v19 = vld [vmem:[%s2232_s2 + $0x30] sm:$0xff]  ;;  %v284_v3 = vld [vmem:[#allocation3] sm:$0xff] }
  0x19   : > { %1584 = vmatpush3.bf16.msra.mxu0 %v1917_v5  ;;  %1606 = vmatprep.subr.bf16.mxu1 %v1846_v4  ;;  %v1951_v15 = vstv %s367_s12  ;;  %vm551_vm1 = vcmp.eq.s32.totalorder %v1932_v10, %v1949_v14  ;;  %vm642_vm2 = vcmp.eq.s32.totalorder %v1934_v11, %v1949_v14  ;;  %v1964_v18 = vstv %s822_s21  ;;  %v274_v20 = vld [vmem:[%s2232_s2 + $0x38] sm:$0xff]  ;;  %v275_v25 = vld [vmem:[%s2232_s2 + $0x40] sm:$0xff]  ;;  %s458_s25 = sadd.s32 2, %s1893_s19  ;;  %s731_s26 = sadd.s32 5, %s1893_s19 }
  0x1a   : > { %1585 = vmatprep.subr.bf16.mxu0 %v1846_v4  ;;  %1608 = vmatpush3.bf16.msra.mxu1 %v1917_v5  ;;  %v552_v17 = vsel %vm551_vm1, 1, %v1849_v8  ;;  %vm369_vm3 = vcmp.eq.s32.totalorder %v1951_v15, %v1949_v14  ;;  %v643_v22 = vsel %vm642_vm2, 1, %v1849_v8  ;;  %vm824_vm4 = vcmp.eq.s32.totalorder %v1964_v18, %v1949_v14  ;;  %v276_v26 = vld [vmem:[%s2232_s2 + $0x48] sm:$0xff]  ;;  %v277_v29 = vld [vmem:[%s2232_s2 + $0x50] sm:$0xff]  ;;  %v278_v30 = vld [vmem:[%s2232_s2 + $0x58] sm:$0xff]  ;;  %s913_s28 = sadd.s32 7, %s1893_s19 }
  0x1b   : > { %1609 = vmatprep.subr.bf16.mxu1 %v1846_v4  ;;  %1369 = vmatprep.mubr.msk.f32.mxu1 %vm1847_vm0, %v1848_v7  ;;  %v370_v21 = vsel %vm369_vm3, 1, %v1849_v8  ;;  %v1982_v23 = vpack.c.bf16 %v274_v20, %v273_v19  ;;  %v825_v27 = vsel %vm824_vm4, 1, %v1849_v8  ;;  %vm359_vm5 = vcmp.lt.s32.totalorder %v358_v24, %v1949_v14  ;;  %v279_v33 = vld [vmem:[%s2232_s2 + $0x60] sm:$0xff]  ;;  %v280_v34 = vld [vmem:[%s2232_s2 + $0x68] sm:$0xff]  ;;  %v281_v36 = vld [vmem:[%s2232_s2 + $0x70] sm:$0xff]  ;;  %s1004_s29 = sadd.s32 8, %s1893_s19 }
  0x1c   : > { %554 = vperm.xlu1 %1804, %v552_v17   ;;  %372 = vperm.xlu0 %1803, %v370_v21   ;;  %v1997_v28 = vpack.c.bf16 %v276_v26, %v275_v25  ;;  %v360_v31 = vsel %vm359_vm5, 1, %v1849_v8  ;;  %v2010_v32 = vpack.c.bf16 %v278_v30, %v277_v29  ;;  %v2022_v35 = vpack.c.bf16 %v280_v34, %v279_v33  ;;  %v282_v37 = vld [vmem:[%s2232_s2 + $0x78] sm:$0xff]  ;;  %v283_v39 = vld [vmem:[#allocation2] sm:$0xff]  ;;  %v1149_v61 = vld [vmem:[%s1900_s24 + $0x8] sm:$0xff] }
  0x1d   : > { %1587 = vmatpush3.bf16.msra.mxu0 %v1930_v9  ;;  %v2034_v38 = vpack.c.bf16 %v282_v37, %v281_v36  ;;  %v459_v40 = vstv %s458_s25  ;;  %v2063_v41 = vstv %s731_s26  ;;  %v2070_v43 = vstv %s913_s28  ;;  %v286_v49 = vld [vmem:[%s1900_s24] sm:$0xff] }
  0x1e   : > { %1588 = vmatprep.subr.bf16.mxu0 %v1846_v4  ;;  %1611 = vmatpush3.bf16.msra.mxu1 %v1930_v9  ;;  %vm460_vm6 = vcmp.eq.s32.totalorder %v459_v40, %v1949_v14  ;;  %vm733_vm7 = vcmp.eq.s32.totalorder %v2063_v41, %v1949_v14  ;;  %vm915_vm8 = vcmp.eq.s32.totalorder %v2070_v43, %v1949_v14  ;;  %v1151_v19 = vld [vmem:[%s1900_s24 + $0x10] sm:$0xff]  ;;  %v1153_v29 = vld [vmem:[%s1900_s24 + $0x18] sm:$0xff] }
  0x1f   : > { %1612 = vmatprep.subr.bf16.mxu1 %v1846_v4  ;;  %v461_v42 = vsel %vm460_vm6, 1, %v1849_v8  ;;  %v734_v44 = vsel %vm733_vm7, 1, %v1849_v8  ;;  %v916_v45 = vsel %vm915_vm8, 1, %v1849_v8  ;;  %vm449_vm9 = vcmp.lt.s32.totalorder %v1951_v15, %v1949_v14 }
  0x20   : > { %645 = vperm.xlu1 %1804, %v643_v22   ;;  %463 = vperm.xlu0 %1803, %v461_v42   ;;  %v450_v46 = vsel %vm449_vm9, 1, %v1849_v8  ;;  %vm540_vm11 = vcmp.lt.s32.totalorder %v459_v40, %v1949_v14  ;;  %vm631_vm15 = vcmp.lt.s32.totalorder %v1932_v10, %v1949_v14  ;;  %vm722_vm3 = vcmp.lt.s32.totalorder %v1934_v11, %v1949_v14  ;;  %v1155_v40 = vld [vmem:[%s1900_s24 + $0x20] sm:$0xff] }
  0x21   : > { %1590 = vmatpush3.bf16.msra.mxu0 %v1961_v16  ;;  %v541_v57 = vsel %vm540_vm11, 1, %v1849_v8  ;;  %v632_v17 = vsel %vm631_vm15, 1, %v1849_v8  ;;  %v723_v10 = vsel %vm722_vm3, 1, %v1849_v8  ;;  %vm813_vm6 = vcmp.lt.s32.totalorder %v2063_v41, %v1949_v14 }
  0x22   : > { %1591 = vmatprep.subr.bf16.mxu0 %v1846_v4  ;;  %1614 = vmatpush3.bf16.msra.mxu1 %v1961_v16  ;;  %v814_v11 = vsel %vm813_vm6, 1, %v1849_v8  ;;  %vm995_vm11 = vcmp.lt.s32.totalorder %v2070_v43, %v1949_v14 }
  0x23   : > { %1615 = vmatprep.subr.bf16.mxu1 %v1846_v4 }
  0x24   : > { %827 = vperm.xlu1 %1804, %v825_v27   ;;  %736 = vperm.xlu0 %1803, %v734_v44  }
  0x25   : > { %1593 = vmatpush3.bf16.msra.mxu0 %v1982_v23 }
  0x26   : > { %1594 = vmatprep.subr.bf16.mxu0 %v1846_v4  ;;  %1617 = vmatpush3.bf16.msra.mxu1 %v1982_v23 }
  0x27   : > { %1618 = vmatprep.subr.bf16.mxu1 %v1846_v4 }
  0x28   : > { %362 = vperm.xlu1 %1804, %v360_v31   ;;  %918 = vperm.xlu0 %1803, %v916_v45  }
  0x29   : > { %1596 = vmatpush3.bf16.msra.mxu0 %v1997_v28 }
  0x2a   : > { %1597 = vmatprep.subr.bf16.mxu0 %v1846_v4  ;;  %1620 = vmatpush3.bf16.msra.mxu1 %v1997_v28 }
  0x2b   : > { %1621 = vmatprep.subr.bf16.mxu1 %v1846_v4 }
  0x2c   : > { %452 = vperm.xlu0 %1803, %v450_v46   ;;  %543 = vperm.xlu1 %1804, %v541_v57  }
  0x2d   : > { %1599 = vmatpush3.bf16.msra.mxu0 %v2010_v32 }
  0x2e   : > { %1600 = vmatprep.subr.bf16.mxu0 %v1846_v4  ;;  %1623 = vmatpush3.bf16.msra.mxu1 %v2010_v32 }
  0x2f   : > { %1624 = vmatprep.subr.bf16.mxu1 %v1846_v4 }
  0x30   : > { %634 = vperm.xlu0 %1803, %v632_v17   ;;  %725 = vperm.xlu1 %1804, %v723_v10  }
  0x31   : > { %1602 = vmatpush3.bf16.msra.mxu0 %v2022_v35 }
  0x32   : > { %1603 = vmatprep.subr.bf16.mxu0 %v1846_v4  ;;  %1626 = vmatpush3.bf16.msra.mxu1 %v2022_v35 }
  0x33   : > { %1627 = vmatprep.subr.bf16.mxu1 %v1846_v4 }
  0x34   : > { %816 = vperm.xlu0 %1803, %v814_v11  }
  0x35   : > { %1605 = vmatpush3.bf16.msra.mxu0 %v2034_v38 }
  0x36   : > { %1630 = vmatprep.subr.bf16.mxu0 %v1846_v4  ;;  %1629 = vmatpush3.bf16.msra.mxu1 %v2034_v38 }
  0x37   : > { %1654 = vmatprep.subr.bf16.mxu1 %v1846_v4 }
  0x38   : > { %1335 = vmatmul.mubr.f32.vlgmr.msra.gmra.mrb[0].mxu0 %v283_v39 }
  0x39   : > { %1632 = vmatpush3.bf16.msra.mxu0 %v1917_v5  ;;  %1404 = vmatprep.mubr.msk.f32.mxu0 %vm1847_vm0, %v1848_v7 }
  0x3a   : > { %1633 = vmatprep.subr.bf16.mxu0 %v1846_v4 }
  0x3d   : > { %1635 = vmatpush3.bf16.msra.mxu0 %v1930_v9 }
  0x3e   : > { %1636 = vmatprep.subr.bf16.mxu0 %v1846_v4 }
  0x41   : > { %1638 = vmatpush3.bf16.msra.mxu0 %v1961_v16 }
  0x42   : > { %1639 = vmatprep.subr.bf16.mxu0 %v1846_v4 }
  0x45   : > { %1641 = vmatpush3.bf16.msra.mxu0 %v1982_v23 }
  0x46   : > { %1642 = vmatprep.subr.bf16.mxu0 %v1846_v4 }
  0x49   : > { %1644 = vmatpush3.bf16.msra.mxu0 %v1997_v28 }
  0x4a   : > { %1645 = vmatprep.subr.bf16.mxu0 %v1846_v4 }
  0x4d   : > { %1647 = vmatpush3.bf16.msra.mxu0 %v2010_v32 }
  0x4e   : > { %1648 = vmatprep.subr.bf16.mxu0 %v1846_v4 }
  0x51   : > { %1650 = vmatpush3.bf16.msra.mxu0 %v2022_v35 }
  0x52   : > { %1651 = vmatprep.subr.bf16.mxu0 %v1846_v4 }
  0x55   : > { %1653 = vmatpush3.bf16.msra.mxu0 %v2034_v38 }
  0x56   : > { %1678 = vmatprep.subr.bf16.mxu0 %v1846_v4 }
  0x9b   : > { %v2079_v47 = vpop.permute.xlu1 %554  ;;  %v373_v58 = vpop.permute.xlu0 %372 }
  0x9c   : > { %vm374_vm12 = vcmp.eq.s32.totalorder %v373_v58, 1  ;;  %vm556_vm1 = vcmp.eq.s32.totalorder %v2079_v47, 1 }
  0x9f   : > { %v2081_v48 = vpop.permute.xlu1 %645  ;;  %v464_v59 = vpop.permute.xlu0 %463 }
  0xa0   : > { %vm465_vm13 = vcmp.eq.s32.totalorder %v464_v59, 1  ;;  %vm647_vm4 = vcmp.eq.s32.totalorder %v2081_v48, 1 }
  0xa3   : > { %v2084_v53 = vpop.permute.xlu1 %827  ;;  %v2107_v60 = vpop.permute.xlu0 %736 }
  0xa4   : > { %vm738_vm7 = vcmp.eq.s32.totalorder %v2107_v60, 1  ;;  %vm829_vm9 = vcmp.eq.s32.totalorder %v2084_v53, 1 }
  0xa7   : > { %v363_v54 = vpop.permute.xlu1 %362  ;;  %v2110_v1 = vpop.permute.xlu0 %918 }
  0xa8   : > { %vm364_vm10 = vcmp.eq.s32.totalorder %v363_v54, 1 }
  0xab   : > { %v453_v2 = vpop.permute.xlu0 %452  ;;  %v544_v24 = vpop.permute.xlu1 %543 }
  0xac   : > { %vm454_vm14 = vcmp.eq.s32.totalorder %v453_v2, 1  ;;  %vm545_vm2 = vcmp.eq.s32.totalorder %v544_v24, 1 }
  0xaf   : > { %v635_v34 = vpop.permute.xlu0 %634  ;;  %v726_v46 = vpop.permute.xlu1 %725 }
  0xb0   : > { %vm636_vm5 = vcmp.eq.s32.totalorder %v635_v34, 1  ;;  %vm727_vm8 = vcmp.eq.s32.totalorder %v726_v46, 1 }
 0x10b   : > { %v353_v50 = vpop.f32.mrb[0].mxu0 }
 0x10c   : > { %v354_v51 = vadd.f32 %v353_v50, %v286_v49  ;;  %v1336_v52 = vpop.f32.mrb[1].mxu0  ;;  %v1159_v50 = vld [vmem:[%s1900_s24 + $0x30] sm:$0xff] }
 0x10e   : > { %1805 = vtanh.f32 %v354_v51 }
 0x118   : > { %v1806_v55 = vpop.eup %1805 }
 0x119   : > { %v365_v56 = vsel %vm364_vm10, %v1806_v55, 0.0  ;;  %1370 = vmatmul.mubr.f32.vlgmr.msra.gmra.mrb[0].mxu1 %v1806_v55  ;;  %v375_v12 = vsel %vm374_vm12, %v1806_v55, %v284_v3 }
 0x11a   : > { %366 = vst [vmem:[%s1905_s27] sm:$0xff] %v365_v56  ;;  %1656 = vmatpush3.bf16.msra.mxu1 %v1917_v5  ;;  %1439 = vmatprep.mubr.msk.f32.mxu1 %vm1847_vm0, %v1848_v7 }
 0x11b   : > { %1657 = vmatprep.subr.bf16.mxu1 %v1846_v4 }
 0x11e   : > { %1659 = vmatpush3.bf16.msra.mxu1 %v1930_v9 }
 0x11f   : > { %1660 = vmatprep.subr.bf16.mxu1 %v1846_v4 }
 0x122   : > { %1662 = vmatpush3.bf16.msra.mxu1 %v1961_v16 }
 0x123   : > { %1663 = vmatprep.subr.bf16.mxu1 %v1846_v4 }
 0x126   : > { %1665 = vmatpush3.bf16.msra.mxu1 %v1982_v23 }
 0x127   : > { %1666 = vmatprep.subr.bf16.mxu1 %v1846_v4 }
 0x12a   : > { %1668 = vmatpush3.bf16.msra.mxu1 %v1997_v28 }
 0x12b   : > { %1669 = vmatprep.subr.bf16.mxu1 %v1846_v4 }
 0x12e   : > { %1671 = vmatpush3.bf16.msra.mxu1 %v2010_v32 }
 0x12f   : > { %1672 = vmatprep.subr.bf16.mxu1 %v1846_v4 }
 0x132   : > { %1674 = vmatpush3.bf16.msra.mxu1 %v2022_v35 }
 0x133   : > { %1675 = vmatprep.subr.bf16.mxu1 %v1846_v4 }
 0x136   : > { %1677 = vmatpush3.bf16.msra.mxu1 %v2034_v38 }
 0x137   : > { %1702 = vmatprep.subr.bf16.mxu1 %v1846_v4 }
 0x1ec   : > { %v444_v62 = vpop.f32.mrb[0].mxu1 }
 0x1ed   : > { %v445_v63 = vadd.f32 %v1149_v61, %v444_v62  ;;  %v1371_v0 = vpop.f32.mrb[1].mxu1 }
 0x1ef   : > { %1807 = vtanh.f32 %v445_v63 }
 0x1f9   : > { %v1808_v6 = vpop.eup %1807 }
 0x1fa   : > { %v466_v13 = vsel %vm465_vm13, %v1808_v6, %v375_v12  ;;  %v455_v15 = vsel %vm454_vm14, %v1808_v6, 0.0  ;;  %1405 = vmatmul.mubr.f32.vlgmr.msra.gmra.mrb[2].mxu0 %v1808_v6  ;;  %vm920_vm13 = vcmp.eq.s32.totalorder %v2110_v1, 1 }
 0x1fb   : > { %1150 = vst [vmem:[%s1905_s27 + $0x8] sm:$0xff] %v455_v15  ;;  %1680 = vmatpush3.bf16.msra.mxu0 %v1917_v5  ;;  %1474 = vmatprep.mubr.msk.f32.mxu0 %vm1847_vm0, %v1848_v7 }
 0x1fc   : > { %1681 = vmatprep.subr.bf16.mxu0 %v1846_v4 }
 0x1ff   : > { %1683 = vmatpush3.bf16.msra.mxu0 %v1930_v9 }
 0x200   : > { %1684 = vmatprep.subr.bf16.mxu0 %v1846_v4 }
 0x203   : > { %1686 = vmatpush3.bf16.msra.mxu0 %v1961_v16 }
 0x204   : > { %1687 = vmatprep.subr.bf16.mxu0 %v1846_v4 }
 0x207   : > { %1689 = vmatpush3.bf16.msra.mxu0 %v1982_v23 }
 0x208   : > { %1690 = vmatprep.subr.bf16.mxu0 %v1846_v4 }
 0x20b   : > { %1692 = vmatpush3.bf16.msra.mxu0 %v1997_v28 }
 0x20c   : > { %1693 = vmatprep.subr.bf16.mxu0 %v1846_v4 }
 0x20f   : > { %1695 = vmatpush3.bf16.msra.mxu0 %v2010_v32 }
 0x210   : > { %1696 = vmatprep.subr.bf16.mxu0 %v1846_v4 }
 0x213   : > { %1698 = vmatpush3.bf16.msra.mxu0 %v2022_v35 }
 0x214   : > { %1699 = vmatprep.subr.bf16.mxu0 %v1846_v4 }
 0x217   : > { %1701 = vmatpush3.bf16.msra.mxu0 %v2034_v38 }
 0x218   : > { %1726 = vmatprep.subr.bf16.mxu0 %v1846_v4 }
 0x2cd   : > { %v535_v20 = vpop.f32.mrb[2].mxu0 }
 0x2ce   : > { %v536_v21 = vadd.f32 %v1151_v19, %v535_v20  ;;  %v1406_v22 = vpop.f32.mrb[3].mxu0 }
 0x2d0   : > { %1809 = vtanh.f32 %v536_v21 }
 0x2da   : > { %v1810_v25 = vpop.eup %1809 }
 0x2db   : > { %v557_v26 = vsel %vm556_vm1, %v1810_v25, %v466_v13  ;;  %v546_v27 = vsel %vm545_vm2, %v1810_v25, 0.0  ;;  %1440 = vmatmul.mubr.f32.vlgmr.msra.gmra.mrb[2].mxu1 %v1810_v25 }
 0x2dc   : > { %1152 = vst [vmem:[%s1905_s27 + $0x10] sm:$0xff] %v546_v27  ;;  %1704 = vmatpush3.bf16.msra.mxu1 %v1917_v5  ;;  %1509 = vmatprep.mubr.msk.f32.mxu1 %vm1847_vm0, %v1848_v7 }
 0x2dd   : > { %1705 = vmatprep.subr.bf16.mxu1 %v1846_v4 }
 0x2e0   : > { %1707 = vmatpush3.bf16.msra.mxu1 %v1930_v9 }
 0x2e1   : > { %1708 = vmatprep.subr.bf16.mxu1 %v1846_v4 }
 0x2e4   : > { %1710 = vmatpush3.bf16.msra.mxu1 %v1961_v16 }
 0x2e5   : > { %1711 = vmatprep.subr.bf16.mxu1 %v1846_v4 }
 0x2e8   : > { %1713 = vmatpush3.bf16.msra.mxu1 %v1982_v23 }
 0x2e9   : > { %1714 = vmatprep.subr.bf16.mxu1 %v1846_v4 }
 0x2ec   : > { %1716 = vmatpush3.bf16.msra.mxu1 %v1997_v28 }
 0x2ed   : > { %1717 = vmatprep.subr.bf16.mxu1 %v1846_v4 }
 0x2f0   : > { %1719 = vmatpush3.bf16.msra.mxu1 %v2010_v32 }
 0x2f1   : > { %1720 = vmatprep.subr.bf16.mxu1 %v1846_v4 }
 0x2f4   : > { %1722 = vmatpush3.bf16.msra.mxu1 %v2022_v35 }
 0x2f5   : > { %1723 = vmatprep.subr.bf16.mxu1 %v1846_v4 }
 0x2f8   : > { %1725 = vmatpush3.bf16.msra.mxu1 %v2034_v38 }
 0x2f9   : > { %1750 = vmatprep.subr.bf16.mxu1 %v1846_v4 }
 0x3ae   : > { %v626_v30 = vpop.f32.mrb[2].mxu1 }
 0x3af   : > { %v627_v31 = vadd.f32 %v1153_v29, %v626_v30  ;;  %v1441_v33 = vpop.f32.mrb[3].mxu1 }
 0x3b1   : > { %1811 = vtanh.f32 %v627_v31 }
 0x3bb   : > { %v1812_v36 = vpop.eup %1811 }
 0x3bc   : > { %v648_v37 = vsel %vm647_vm4, %v1812_v36, %v557_v26  ;;  %v637_v39 = vsel %vm636_vm5, %v1812_v36, 0.0  ;;  %1475 = vmatmul.mubr.f32.vlgmr.msra.gmra.mrb[4].mxu0 %v1812_v36 }
 0x3bd   : > { %1154 = vst [vmem:[%s1905_s27 + $0x18] sm:$0xff] %v637_v39  ;;  %1728 = vmatpush3.bf16.msra.mxu0 %v1917_v5  ;;  %1544 = vmatprep.mubr.msk.f32.mxu0 %vm1847_vm0, %v1848_v7 }
 0x3be   : > { %1729 = vmatprep.subr.bf16.mxu0 %v1846_v4 }
 0x3c1   : > { %1731 = vmatpush3.bf16.msra.mxu0 %v1930_v9 }
 0x3c2   : > { %1732 = vmatprep.subr.bf16.mxu0 %v1846_v4 }
 0x3c5   : > { %1734 = vmatpush3.bf16.msra.mxu0 %v1961_v16 }
 0x3c6   : > { %1735 = vmatprep.subr.bf16.mxu0 %v1846_v4 }
 0x3c9   : > { %1737 = vmatpush3.bf16.msra.mxu0 %v1982_v23 }
 0x3ca   : > { %1738 = vmatprep.subr.bf16.mxu0 %v1846_v4 }
 0x3cd   : > { %1740 = vmatpush3.bf16.msra.mxu0 %v1997_v28 }
 0x3ce   : > { %1741 = vmatprep.subr.bf16.mxu0 %v1846_v4 }
 0x3d1   : > { %1743 = vmatpush3.bf16.msra.mxu0 %v2010_v32 }
 0x3d2   : > { %1744 = vmatprep.subr.bf16.mxu0 %v1846_v4 }
 0x3d5   : > { %1746 = vmatpush3.bf16.msra.mxu0 %v2022_v35 }
 0x3d6   : > { %1747 = vmatprep.subr.bf16.mxu0 %v1846_v4 }
 0x3d9   : > { %1749 = vmatpush3.bf16.msra.mxu0 %v2034_v38 }
 0x48f   : > { %v717_v42 = vpop.f32.mrb[4].mxu0 }
 0x490   : > { %v718_v44 = vadd.f32 %v1155_v40, %v717_v42  ;;  %v1476_v45 = vpop.f32.mrb[5].mxu0 }
 0x492   : > { %1813 = vtanh.f32 %v718_v44 }
 0x49c   : > { %v1814_v47 = vpop.eup %1813 }
 0x49d   : > { %v739_v48 = vsel %vm738_vm7, %v1814_v47, %v648_v37  ;;  %v728_v49 = vsel %vm727_vm8, %v1814_v47, 0.0  ;;  %1510 = vmatmul.mubr.f32.vlgmr.msra.gmra.mrb[4].mxu1 %v1814_v47 }
 0x49e   : > { %1156 = vst [vmem:[%s1905_s27 + $0x20] sm:$0xff] %v728_v49  ;;  %1752 = vmatpush3.bf16.msra.mxu1 %v1917_v5  ;;  %1579 = vmatprep.mubr.msk.f32.mxu1 %vm1847_vm0, %v1848_v7  ;;  %vm904_vm0 = vcmp.lt.s32.totalorder %v1964_v18, %v1949_v14  ;;  %v1157_v7 = vld [vmem:[%s1900_s24 + $0x28] sm:$0xff]  ;;  %v996_v18 = vsel %vm995_vm11, 1, %v1849_v8 }
 0x49f   : > { %1753 = vmatprep.subr.bf16.mxu1 %v1846_v4  ;;  %v905_v5 = vsel %vm904_vm0, 1, %v1849_v8  ;;  %998 = vperm.xlu0 %1803, %v996_v18  }
 0x4a0   : > { %907 = vperm.xlu1 %1804, %v905_v5  }
 0x4a2   : > { %1755 = vmatpush3.bf16.msra.mxu1 %v1930_v9 }
 0x4a3   : > { %1756 = vmatprep.subr.bf16.mxu1 %v1846_v4 }
 0x4a6   : > { %1758 = vmatpush3.bf16.msra.mxu1 %v1961_v16 }
 0x4a7   : > { %1759 = vmatprep.subr.bf16.mxu1 %v1846_v4 }
 0x4aa   : > { %1761 = vmatpush3.bf16.msra.mxu1 %v1982_v23 }
 0x4ab   : > { %1762 = vmatprep.subr.bf16.mxu1 %v1846_v4 }
 0x4ae   : > { %1764 = vmatpush3.bf16.msra.mxu1 %v1997_v28  ;;  %v817_v28 = vpop.permute.xlu0 %816 }
 0x4af   : > { %1765 = vmatprep.subr.bf16.mxu1 %v1846_v4  ;;  %vm818_vm10 = vcmp.eq.s32.totalorder %v817_v28, 1 }
 0x4b2   : > { %1767 = vmatpush3.bf16.msra.mxu1 %v2010_v32 }
 0x4b3   : > { %1768 = vmatprep.subr.bf16.mxu1 %v1846_v4 }
 0x4b6   : > { %1770 = vmatpush3.bf16.msra.mxu1 %v2022_v35 }
 0x4b7   : > { %1771 = vmatprep.subr.bf16.mxu1 %v1846_v4 }
 0x4ba   : > { %1773 = vmatpush3.bf16.msra.mxu1 %v2034_v38  ;;  %v1005_v38 = vstv %s1004_s29 }
 0x4bb   : > { %vm1006_vm12 = vcmp.eq.s32.totalorder %v1005_v38, %v1949_v14  ;;  %v1161_v14 = vld [vmem:[%s1900_s24 + $0x38] sm:$0xff] }
 0x4bc   : > { %v1007_v41 = vsel %vm1006_vm12, 1, %v1849_v8 }
 0x4bd   : > { %1009 = vperm.xlu1 %1804, %v1007_v41  }
 0x51e   : > { %v999_v59 = vpop.permute.xlu0 %998 }
 0x51f   : > { %v908_v54 = vpop.permute.xlu1 %907  ;;  %vm1000_vm15 = vcmp.eq.s32.totalorder %v999_v59, 1 }
 0x520   : > { %vm909_vm14 = vcmp.eq.s32.totalorder %v908_v54, 1 }
 0x53c   : > { %v1010_v60 = vpop.permute.xlu1 %1009 }
 0x53d   : > { %vm1011_vm1 = vcmp.eq.s32.totalorder %v1010_v60, 1 }
 0x570   : > { %v808_v9 = vpop.f32.mrb[4].mxu1 }
 0x571   : > { %v809_v16 = vadd.f32 %v1157_v7, %v808_v9  ;;  %v1511_v23 = vpop.f32.mrb[5].mxu1 }
 0x573   : > { %1815 = vtanh.f32 %v809_v16 }
 0x57d   : > { %v1816_v4 = vpop.eup %1815 }
 0x57e   : > { %v830_v32 = vsel %vm829_vm9, %v1816_v4, %v739_v48  ;;  %v819_v35 = vsel %vm818_vm10, %v1816_v4, 0.0  ;;  %1545 = vmatmul.mubr.f32.vlgmr.msra.gmra.mrb[6].mxu0 %v1816_v4 }
 0x57f   : > { %1158 = vst [vmem:[%s1905_s27 + $0x28] sm:$0xff] %v819_v35 }
 0x651   : > { %v899_v51 = vpop.f32.mrb[6].mxu0 }
 0x652   : > { %v900_v52 = vadd.f32 %v1159_v50, %v899_v51  ;;  %v1546_v53 = vpop.f32.mrb[7].mxu0 }
 0x654   : > { %1817 = vtanh.f32 %v900_v52 }
 0x65e   : > { %v1818_v43 = vpop.eup %1817 }
 0x65f   : > { %v921_v55 = vsel %vm920_vm13, %v1818_v43, %v830_v32  ;;  %v910_v56 = vsel %vm909_vm14, %v1818_v43, 0.0  ;;  %1580 = vmatmul.mubr.f32.vlgmr.msra.gmra.mrb[6].mxu1 %v1818_v43 }
 0x660   : > { %1160 = vst [vmem:[%s1905_s27 + $0x30] sm:$0xff] %v910_v56 }
 0x732   : > { %v990_v57 = vpop.f32.mrb[6].mxu1 }
 0x733   : > { %v991_v58 = vadd.f32 %v1161_v14, %v990_v57  ;;  %v1581_v8 = vpop.f32.mrb[7].mxu1 }
 0x735   : > { %1819 = vtanh.f32 %v991_v58 }
 0x73f   : > { %v1820_v61 = vpop.eup %1819 }
 0x740   : > { %v1001_v62 = vsel %vm1000_vm15, %v1820_v61, 0.0  ;;  %v1012_v63 = vsel %vm1011_vm1, %v1820_v61, %v921_v55  ;;  %1013 = vst [vmem:[#allocation2] sm:$0xff] %v1820_v61 }
 0x741   : > { %1162 = vst [vmem:[%s1905_s27 + $0x38] sm:$0xff] %v1001_v62  ;;  %1014 = vst [vmem:[#allocation3] sm:$0xff] %v1012_v63 }
 0x742   : > { %1015 = vst [vmem:[%s2234_s4] sm:$0xff] %v1012_v63 }
 0x743 PF: > { %s15_s17 = sadd.s32 1, %s1843_s17   ;;  %s2235_s15 = smov %s1839_s16 }
 0x744   : > { %p12_p6 = scmp.ge.s32.totalorder %s15_s17, 4   ;;  %s2236_s16 = smov %s2238_s18 }
 0x746   :  { %14 = sbr.rel (!%p12_p6) target bundleno = 2 (0x2), region = 95 }

</bundles_post_ra>
